<compile_context>
chip_gen: v5e
topology: v5e:2x2
jax: 0.10.0
libtpu: 0.0.40
codegen_flags: <defaults>
</compile_context>

<pallas_src>
import functools

import jax
import jax.numpy as jnp
from jax import lax
from jax.experimental import pallas as pl
from jax.experimental.pallas import tpu as pltpu


def _label_smooth_kernel(x_ref, t_ref, out_ref, *, smoothing, n_total, tile_n):
    """One grid step: (TN, C) logits + (TN, 1) targets -> one partial-sum tile."""
    x = x_ref[...].astype(jnp.float32)          # cast in VMEM, stream native dtype
    t = t_ref[...]                              # (TN, 1) int32
    tn, c = x.shape

    # log-softmax pieces (class axis = lane axis).
    # TODO(synk): for vocab-scale C, tile the class axis in-kernel with an
    # online (running max / running exp-sum) log-softmax to bound VMEM on v7x.
    m = jnp.max(x, axis=-1, keepdims=True)                               # (TN, 1)
    shifted = x - m
    lse = jnp.log(jnp.sum(jnp.exp(shifted), axis=-1, keepdims=True))     # (TN, 1)

    off = jnp.float32(smoothing / (c - 1.0)) if c > 1 else jnp.float32(0.0)
    on = jnp.float32(1.0 - smoothing)

    # Fused weighted reduction. sum_c(w_c) = (C-1)*off + on = 1 exactly, so
    #   per_row = sum_c(-w_c * (shifted_c - lse)) = lse - sum_c(w_c * shifted_c)
    col = lax.broadcasted_iota(jnp.int32, (tn, c), dimension=1)
    w = jnp.where(col == t, on, off)                                     # (TN, C)
    per_row = lse - jnp.sum(w * shifted, axis=-1, keepdims=True)         # (TN, 1)

    # Zero rows past the true batch size (ragged last block: tail rows are
    # uninitialized data; the select keeps any NaN/Inf there out of the sum).
    row = (lax.broadcasted_iota(jnp.int32, (tn, 1), dimension=0)
           + pl.program_id(0) * tile_n)
    masked = jnp.where(row < n_total, per_row, 0.0)                      # (TN, 1)

    # Per-block partial sum, placed at [0,0] of an (8,128)-aligned tile so the
    # store is a single unmasked lane-dense vst (no (TN,1) masked stores).
    partial = jnp.sum(masked, axis=0, keepdims=True)                     # (1, 1)
    r8 = lax.broadcasted_iota(jnp.int32, (8, 128), dimension=0)
    c8 = lax.broadcasted_iota(jnp.int32, (8, 128), dimension=1)
    out_ref[...] = jnp.where((r8 == 0) & (c8 == 0), partial, jnp.float32(0.0))


def _pick_tile_n(n, c, dtype):
    """Row-tile size from a cross-generation-safe total-VMEM budget."""
    itemsize = jnp.dtype(dtype).itemsize
    # Sublane packing granularity: 8 (f32), 16 (bf16), 32 (int8/fp8).
    sub = max(8, 32 // itemsize)
    # Budget the TOTAL in-flight footprint per grid step:
    #   2x double-buffered native logits tile  +  ~4 live f32 (tile_n, C)
    #   intermediates (x_f32 / shifted / exp / weighted).
    # ~24 MiB keeps headroom under the 32 MiB scoped-VMEM default (v6e/v7x)
    # and the explicitly raised 32 MiB limit on v5e.
    per_row_bytes = c * (2 * itemsize + 4 * 4)
    rows = max(sub, (24 * 1024 * 1024 // max(1, per_row_bytes)) // sub * sub)
    # Whole batch in one exact full-dim block when it fits (no ragged tail).
    return n if n <= rows else rows


def label_smooth_loss(logits, targets, smoothing=0.0, *, tile_n=None):
    """logits: (..., C) float (f32 or bf16); targets: (...,) int. Returns scalar f32."""
    c = logits.shape[-1]
    # Note: with C < 128 only part of each vreg lane group carries data; such
    # shapes are overhead-dominated and not the target regime for this kernel.
    x = logits.reshape(-1, c)                         # keep native dtype in HBM
    t = targets.reshape(-1, 1).astype(jnp.int32)
    n = x.shape[0]

    if tile_n is None:
        tile_n = _pick_tile_n(n, c, x.dtype)
    # Keep the block legal: either exactly the full row extent or a multiple of 8.
    tile_n = n if tile_n >= n else max(8, (tile_n // 8) * 8)
    grid = pl.cdiv(n, tile_n)                         # last block may be ragged

    kernel = functools.partial(
        _label_smooth_kernel, smoothing=float(smoothing), n_total=n, tile_n=tile_n
    )

    partials = pl.pallas_call(
        kernel,
        out_shape=jax.ShapeDtypeStruct((grid * 8, 128), jnp.float32),
        grid_spec=pltpu.PrefetchScalarGridSpec(
            num_scalar_prefetch=0,
            grid=(grid,),
            in_specs=[
                pl.BlockSpec((tile_n, c), lambda i: (i, 0)),   # class dim never tiled
                pl.BlockSpec((tile_n, 1), lambda i: (i, 0)),
            ],
            out_specs=pl.BlockSpec((8, 128), lambda i: (i, 0)),
        ),
        compiler_params=pltpu.CompilerParams(
            # Distinct output blocks per step -> megacore can split the row
            # axis across both TensorCores on v7x.
            dimension_semantics=("parallel",),
            vmem_limit_bytes=32 * 1024 * 1024,
        ),
    )(x, t)

    # Tiny final reduction in plain JAX (all non-[0,0] tile entries are zero).
    return jnp.sum(partials) / jnp.float32(n)


def _reference(logits, targets, smoothing):
    """Pure-JAX reference mirroring the PyTorch module."""
    c = logits.shape[-1]
    log_prob = jax.nn.log_softmax(logits.astype(jnp.float32), axis=-1)
    weight = jnp.full(logits.shape, smoothing / (c - 1.0), dtype=jnp.float32)
    onehot = jax.nn.one_hot(targets, c, dtype=jnp.float32)
    weight = weight * (1.0 - onehot) + onehot * (1.0 - smoothing)
    return jnp.mean(jnp.sum(-weight * log_prob, axis=-1))


if __name__ == "__main__":
    key = jax.random.PRNGKey(0)
    k1, k2, k3, k4 = jax.random.split(key, 4)
    smoothing = 0.1

    # Test 1: f32 logits, (batch=8, classes=32) -> single exact block.
    logits = jax.random.normal(k1, (8, 32), dtype=jnp.float32)
    targets = jax.random.randint(k2, (8,), 0, 32, dtype=jnp.int32)
    loss = jax.block_until_ready(label_smooth_loss(logits, targets, smoothing=smoothing))
    ref = _reference(logits, targets, smoothing)
    assert jnp.allclose(loss, ref, rtol=1e-5, atol=1e-5), (loss, ref)

    # Test 2: bf16 logits with extra leading dims -> N=26 rows (non-8-aligned
    # full-dim block, native-dtype streaming, no host-side padding).
    logits2 = jax.random.normal(k3, (2, 13, 32), dtype=jnp.bfloat16)
    targets2 = jax.random.randint(k4, (2, 13), 0, 32, dtype=jnp.int32)
    loss2 = jax.block_until_ready(label_smooth_loss(logits2, targets2, smoothing=smoothing))
    ref2 = _reference(logits2, targets2, smoothing)
    assert jnp.allclose(loss2, ref2, rtol=1e-4, atol=1e-4), (loss2, ref2)

    # Test 3: force multiple grid steps with a ragged last block (N=40, tile 16)
    # to exercise the no-pad path + in-kernel row mask + per-block partials.
    k5, k6 = jax.random.split(k1)
    logits3 = jax.random.normal(k5, (40, 32), dtype=jnp.float32)
    targets3 = jax.random.randint(k6, (40,), 0, 32, dtype=jnp.int32)
    loss3 = jax.block_until_ready(
        label_smooth_loss(logits3, targets3, smoothing=smoothing, tile_n=16))
    ref3 = _reference(logits3, targets3, smoothing)
    assert jnp.allclose(loss3, ref3, rtol=1e-5, atol=1e-5), (loss3, ref3)

    print("KERNEL_OK")
</pallas_src>

<mosaic_0001>
module attributes {stable_mosaic.version = 11 : i64} {
  func.func @_label_smooth_kernel(%arg0: i32, %arg1: memref<8x32xf32, #tpu.memory_space<vmem>>, %arg2: memref<8x1xi32, #tpu.memory_space<vmem>>, %arg3: memref<8x128xf32, #tpu.memory_space<vmem>>) attributes {dimension_semantics = [#tpu.dimension_semantics<parallel>], iteration_bounds = array<i64: 1>, scalar_prefetch = 0 : i64, scratch_operands = 0 : i64, tpu.core_type = #tpu.core_type<tc>, window_params = [{transform_indices = @transform_0, window_bounds = array<i64: 8, 32>}, {transform_indices = @transform_1, window_bounds = array<i64: 8, 1>}, {transform_indices = @transform_2, window_bounds = array<i64: 8, 128>}]} {
    %c0 = arith.constant 0 : index
    %c0_0 = arith.constant 0 : index
    %0 = vector.load %arg1[%c0, %c0_0] : memref<8x32xf32, #tpu.memory_space<vmem>>, vector<8x32xf32>
    %c0_1 = arith.constant 0 : index
    %c0_2 = arith.constant 0 : index
    %1 = vector.load %arg2[%c0_1, %c0_2] : memref<8x1xi32, #tpu.memory_space<vmem>>, vector<8x1xi32>
    %cst = arith.constant dense<0xFF800000> : vector<8xf32>
    %2 = vector.multi_reduction <maximumf>, %0, %cst [1] : vector<8x32xf32> to vector<8xf32>
    %3 = vector.shape_cast %2 : vector<8xf32> to vector<8x1xf32>
    %4 = vector.broadcast %3 : vector<8x1xf32> to vector<8x32xf32>
    %5 = arith.subf %0, %4 : vector<8x32xf32>
    %6 = math.exp %5 : vector<8x32xf32>
    %cst_3 = arith.constant dense<0.000000e+00> : vector<8xf32>
    %7 = vector.multi_reduction <add>, %6, %cst_3 [1] : vector<8x32xf32> to vector<8xf32>
    %8 = vector.shape_cast %7 : vector<8xf32> to vector<8x1xf32>
    %9 = math.log %8 : vector<8x1xf32>
    %10 = tpu.iota {dimensions = array<i32: 1>} : vector<8x32xi32>
    %11 = vector.broadcast %1 : vector<8x1xi32> to vector<8x32xi32>
    %12 = arith.cmpi eq, %10, %11 : vector<8x32xi32>
    %cst_4 = arith.constant 0.899999976 : f32
    %cst_5 = arith.constant 0.0032258064 : f32
    %13 = vector.broadcast %cst_4 : f32 to vector<8x32xf32>
    %14 = vector.broadcast %cst_5 : f32 to vector<8x32xf32>
    %15 = arith.select %12, %13, %14 : vector<8x32xi1>, vector<8x32xf32>
    %16 = arith.mulf %15, %5 : vector<8x32xf32>
    %cst_6 = arith.constant dense<0.000000e+00> : vector<8xf32>
    %17 = vector.multi_reduction <add>, %16, %cst_6 [1] : vector<8x32xf32> to vector<8xf32>
    %18 = vector.shape_cast %17 : vector<8xf32> to vector<8x1xf32>
    %19 = arith.subf %9, %18 : vector<8x1xf32>
    %20 = tpu.iota {dimensions = array<i32: 0>} : vector<8x1xi32>
    %c8_i32 = arith.constant 8 : i32
    %21 = arith.muli %arg0, %c8_i32 : i32
    %22 = vector.broadcast %21 : i32 to vector<8x1xi32>
    %23 = arith.addi %20, %22 : vector<8x1xi32>
    %c8_i32_7 = arith.constant 8 : i32
    %24 = vector.broadcast %c8_i32_7 : i32 to vector<8x1xi32>
    %25 = arith.cmpi slt, %23, %24 : vector<8x1xi32>
    %cst_8 = arith.constant 0.000000e+00 : f32
    %26 = vector.broadcast %cst_8 : f32 to vector<8x1xf32>
    %27 = arith.select %25, %19, %26 : vector<8x1xi1>, vector<8x1xf32>
    %cst_9 = arith.constant dense<0.000000e+00> : vector<1xf32>
    %28 = vector.multi_reduction <add>, %27, %cst_9 [0] : vector<8x1xf32> to vector<1xf32>
    %29 = vector.shape_cast %28 : vector<1xf32> to vector<1x1xf32>
    %30 = tpu.iota {dimensions = array<i32: 0>} : vector<8x128xi32>
    %31 = tpu.iota {dimensions = array<i32: 1>} : vector<8x128xi32>
    %c0_i32 = arith.constant 0 : i32
    %32 = vector.broadcast %c0_i32 : i32 to vector<8x128xi32>
    %33 = arith.cmpi eq, %30, %32 : vector<8x128xi32>
    %c0_i32_10 = arith.constant 0 : i32
    %34 = vector.broadcast %c0_i32_10 : i32 to vector<8x128xi32>
    %35 = arith.cmpi eq, %31, %34 : vector<8x128xi32>
    %36 = arith.andi %33, %35 : vector<8x128xi1>
    %cst_11 = arith.constant 0.000000e+00 : f32
    %37 = vector.shape_cast %29 : vector<1x1xf32> to vector<1x1xf32>
    %38 = vector.broadcast %37 : vector<1x1xf32> to vector<8x128xf32>
    %39 = vector.broadcast %cst_11 : f32 to vector<8x128xf32>
    %40 = arith.select %36, %38, %39 : vector<8x128xi1>, vector<8x128xf32>
    %c0_12 = arith.constant 0 : index
    %c0_13 = arith.constant 0 : index
    %41 = vector.load %arg3[%c0_12, %c0_13] : memref<8x128xf32, #tpu.memory_space<vmem>>, vector<8x128xf32>
    tpu.vector_store %arg3[%c0_12, %c0_13], %40 {strides = array<i32>} : memref<8x128xf32, #tpu.memory_space<vmem>>, vector<8x128xf32>,
    return
  }
  func.func @transform_0(%arg0: i32) -> (i32, i32) {
    %c0_i32 = arith.constant 0 : i32
    %c0_i32_0 = arith.constant 0 : i32
    return %arg0, %c0_i32 : i32, i32
  }
  func.func @transform_1(%arg0: i32) -> (i32, i32) {
    %c0_i32 = arith.constant 0 : i32
    %c0_i32_0 = arith.constant 0 : i32
    return %arg0, %c0_i32 : i32, i32
  }
  func.func @transform_2(%arg0: i32) -> (i32, i32) {
    %c0_i32 = arith.constant 0 : i32
    %c0_i32_0 = arith.constant 0 : i32
    return %arg0, %c0_i32 : i32, i32
  }
}

</mosaic_0001>

<bundles_post_ra>
// kernel: tpu_custom_call.1
= control target key start
LH: loop header
LB: loop body
LE: loop exit
PB: predicated region body
PF: predicated region fallthrough
CT: control target
= control target key end

     0   :  { %vm14_vm0 = vcmask 261120   ;;  %s136_s0 = inlined_call_operand.vmem [shape: f32[8,32], index: 0, kind: input, shape index: {}]   ;;  %s137_s1 = inlined_call_operand.vmem [shape: s32[8,1], index: 1, kind: input, shape index: {}]   ;;  %s138_s2 = inlined_call_operand.hbm [shape: f32[8,128], index: 2, kind: output, shape index: {}]  }
   0x1   :  { %v12_v0 = vld [vmem:[%s136_s0] sm:$0xff] }
   0x2   :  { %7 = vsyncpa [#allocation3], 0  ;;  %v15_v1 = vsel %vm14_vm0, %v12_v0, -inf  ;;  %v106_v2 = vmov 0   ;;  %v13_v3 = vld [vmem:[%s137_s1] sm:$0xff]  ;;  %v26_v9 = vlaneseq  ;;  %s108_s0 = smov [#allocation2]  }
   0x3   :  { %75 = vset.pattern.permute.xlu0 %v106_v2  ;;  %v107_v12 = vmov 0.0032258064   ;;  %s61_s1 = sshll.u32 %s108_s0, 4  ;;  %s63_s15 = sshll.u32 %s138_s2, 4  ;;  %s62_s1 = int_to_ptr.vmem [resolvable:$true] %s61_s1  ;;  %s64_s15 = int_to_ptr.hbm [resolvable:$true] %s63_s15 }
   0x4   :  { %16 = vmax.xlane.f32.xlu0 %v15_v1  ;;  %v27_v10 = vand.u32 127, %v26_v9  ;;  %v39_v23 = vshrl.u32 %v26_v9, 7 }
   0x6   :  { %vm52_vm2 = vcmp.eq.s32.totalorder %v27_v10, 0  ;;  %vm51_vm3 = vcmp.eq.s32.totalorder %v39_v23, 0 }
   0x7   :  { %vm53_vm4 = vmand %vm51_vm3, %vm52_vm2 }
  0x18   :  { %29 = vperm.xlu0 %75, %v13_v3  }
  0x77   :  { %v17_v4 = vpop.xlane.xlu0 %16 }
  0x78   :  { %v18_v5 = vsub.f32 %v12_v0, %v17_v4 }
  0x7a   :  { %v19_v6 = vmul.f32 1.442695, %v18_v5 }
  0x7c   :  { %76 = vpow2.f32 %v19_v6 }
  0x82   :  { %v77_v7 = vpop.eup %76 }
  0x83   :  { %v21_v8 = vsel %vm14_vm0, %v77_v7, 0.0 }
  0x84   :  { %22 = vadd.xlane.f32.xlu1 %v21_v8 }
  0x8a   :  { %v30_v11 = vpop.permute.xlu0 %29 }
  0x8b   :  { %vm31_vm1 = vcmp.eq.s32.totalorder %v27_v10, %v30_v11 }
  0x8c   :  { %v32_v13 = vsel %vm31_vm1, 0.9, %v107_v12 }
  0x8d   :  { %v33_v14 = vmul.f32 %v32_v13, %v18_v5 }
  0x8f   :  { %v34_v15 = vsel %vm14_vm0, %v33_v14, 0.0 }
  0x90   :  { %35 = vadd.xlane.f32.xlu1 %v34_v15 }
  0xf7   :  { %v23_v16 = vpop.xlane.xlu1 %22 }
  0xf8   :  { %78 = vlog2.f32 %v23_v16 }
  0xfe   :  { %v79_v17 = vpop.eup %78 }
  0xff   :  { %v25_v18 = vmul.f32 0.6931472, %v79_v17 }
 0x103   :  { %v36_v19 = vpop.xlane.xlu1 %35 }
 0x104   :  { %v37_v20 = vsub.f32 %v25_v18, %v36_v19 }
 0x106   :  { %v45_v21 = vrot.slane %v37_v20, 4 }
 0x108   :  { %v46_v22 = vadd.f32 %v45_v21, %v37_v20 }
 0x10a   :  { %v47_v24 = vrot.slane %v46_v22, 2 }
 0x10c   :  { %v48_v25 = vadd.f32 %v47_v24, %v46_v22 }
 0x10e   :  { %v49_v26 = vrot.slane %v48_v25, 1 }
 0x110   :  { %v50_v27 = vadd.f32 %v49_v26, %v48_v25 }
 0x112   :  { %v54_v28 = vsel %vm53_vm4, %v50_v27, 0.0 }
 0x113   :  { %55 = vst [vmem:[#allocation2] sm:$0xff] %v54_v28 }
 0x114   :  { %66 = dma.vmem_to_hbm [thread:$0]  %s62_s1, 128, %s64_s15, [#allocation3]  }
 0x115   :  { %104 = dma.done.wait [#allocation3], 128  }
 0x116   :  { %105 = vsyncadd [#allocation3], 4294967168 }
 0x117   :  { %71 = vsyncpa [#allocation3], 1 }

</bundles_post_ra>
